<compile_context>
chip_gen: v5e
topology: v5e:2x2
jax: 0.10.0
libtpu: 0.0.40
codegen_flags: <defaults>
</compile_context>

<pallas_src>
import math

import jax
import jax.numpy as jnp
from jax.experimental import pallas as pl
from jax.experimental.pallas import tpu as pltpu


# ----------------------------------------------------------------------------
# VMEM budget / tiling helpers
# ----------------------------------------------------------------------------
def _vmem_budget_bytes():
    """Generation-aware VMEM budget: ~half of physical VMEM (v5e/v6e: 64 MiB,
    v7x: 32 MiB), falling back to 32 MiB if the query is unavailable."""
    try:
        cap = pltpu.get_tpu_info().vmem_capacity_bytes
        return max(16 << 20, min(cap // 2, 100 << 20))
    except Exception:  # pragma: no cover - conservative fallback
        return 32 << 20


def _seq_tile(S, B, E, budget_bytes):
    """Largest seq tile whose double-buffered x/out blocks (+ pe block) fit the
    VMEM budget. Prefers an exact divisor of S; otherwise the grid uses cdiv and
    Pallas masks the ragged final block."""
    bytes_per_row = (2 * B * E + E) * 4 * 2  # (x + out) blocks + pe, dbl-buffered, f32
    cap = max(8, budget_bytes // max(bytes_per_row, 1))
    if S <= cap:
        return S
    for t in range(cap, 0, -1):  # largest divisor of S that fits
        if S % t == 0:
            return t
    return cap


# ----------------------------------------------------------------------------
# PE table (matches the PyTorch buffer layout exactly)
# ----------------------------------------------------------------------------
def positional_encoding_table(max_len, d_model):
    """pe[pos, 0, 0::2] = sin(pos * div_term), pe[pos, 0, 1::2] = cos(...)."""
    position = jnp.arange(max_len, dtype=jnp.float32)[:, None]
    div_term = jnp.exp(
        jnp.arange(0, d_model, 2, dtype=jnp.float32) * (-math.log(10000.0) / d_model)
    )
    ang = position * div_term  # (max_len, d_model // 2)
    pe = jnp.stack([jnp.sin(ang), jnp.cos(ang)], axis=-1).reshape(max_len, d_model)
    return pe[:, None, :]  # (max_len, 1, d_model)


# ----------------------------------------------------------------------------
# Pallas kernel: out = x + pe (broadcast over batch)
# ----------------------------------------------------------------------------
def _pe_add_kernel(x_ref, pe_ref, o_ref):
    # (ts, B, E) + (ts, 1, E) -> broadcast over the batch (sublane) dim.
    # Single VPU add; feature dim stays on lanes for dense stores.
    o_ref[...] = x_ref[...] + pe_ref[...]


def positional_encoding(x, pe, *, seq_tile=None):
    """PositionalEncoding.forward (eval mode).

    x : (S, B, E) float32, seq-first.
    pe: (max_len, 1, E) float32 table with max_len >= S; only the blocks
        covering the first S rows are DMA'd (no host-side slicing).
    """
    S, B, E = x.shape
    assert pe.ndim == 3 and pe.shape[1] == 1 and pe.shape[2] == E
    assert pe.shape[0] >= S, "pe table shorter than sequence"

    ts = seq_tile if seq_tile is not None else _seq_tile(S, B, E, _vmem_budget_bytes())
    ts = min(ts, S)
    grid = (pl.cdiv(S, ts),)

    out = pl.pallas_call(
        _pe_add_kernel,
        out_shape=jax.ShapeDtypeStruct((S, B, E), x.dtype),
        grid=grid,
        in_specs=[
            pl.BlockSpec((ts, B, E), lambda i: (i, 0, 0)),
            pl.BlockSpec((ts, 1, E), lambda i: (i, 0, 0)),
        ],
        out_specs=pl.BlockSpec((ts, B, E), lambda i: (i, 0, 0)),
        compiler_params=pltpu.CompilerParams(
            dimension_semantics=("parallel",),  # shards seq blocks across TCs
        ),
    )(x, pe)
    # TODO(synk): nn.Dropout(p=0.1) omitted — identity in eval/inference mode.
    return out


# ----------------------------------------------------------------------------
if __name__ == "__main__":
    key = jax.random.PRNGKey(0)
    k1, k2 = jax.random.split(key)

    # Small shapes implied by the module: seq=8, batch=2, d_model=32.
    S, B, E = 8, 2, 32
    max_len = 5000
    pe = positional_encoding_table(max_len, E)
    x = jax.random.normal(k1, (S, B, E), jnp.float32)

    out = jax.block_until_ready(positional_encoding(x, pe))
    ref = x + pe[:S]
    assert out.shape == (S, B, E)
    assert bool(jnp.all(jnp.isfinite(out)))
    assert bool(jnp.allclose(out, ref, atol=1e-6, rtol=1e-6))

    # Second check: lane-dense feature dim + multi-step grid (exercises tiling).
    S2, B2, E2 = 256, 4, 128
    x2 = jax.random.normal(k2, (S2, B2, E2), jnp.float32)
    out2 = jax.block_until_ready(positional_encoding(x2, positional_encoding_table(512, E2), seq_tile=64))
    ref2 = x2 + positional_encoding_table(512, E2)[:S2]
    assert bool(jnp.allclose(out2, ref2, atol=1e-6, rtol=1e-6))

    print("KERNEL_OK")
</pallas_src>

<mosaic_0001>
module attributes {stable_mosaic.version = 11 : i64} {
  func.func @_pe_add_kernel(%arg0: i32, %arg1: memref<8x2x32xf32, #tpu.memory_space<vmem>>, %arg2: memref<8x1x32xf32, #tpu.memory_space<vmem>>, %arg3: memref<8x2x32xf32, #tpu.memory_space<vmem>>) attributes {dimension_semantics = [#tpu.dimension_semantics<parallel>], iteration_bounds = array<i64: 1>, scalar_prefetch = 0 : i64, scratch_operands = 0 : i64, tpu.core_type = #tpu.core_type<tc>, window_params = [{transform_indices = @transform_0, window_bounds = array<i64: 8, 2, 32>}, {transform_indices = @transform_1, window_bounds = array<i64: 8, 1, 32>}, {transform_indices = @transform_2, window_bounds = array<i64: 8, 2, 32>}]} {
    %c0 = arith.constant 0 : index
    %c0_0 = arith.constant 0 : index
    %c0_1 = arith.constant 0 : index
    %0 = vector.load %arg1[%c0, %c0_0, %c0_1] : memref<8x2x32xf32, #tpu.memory_space<vmem>>, vector<8x2x32xf32>
    %c0_2 = arith.constant 0 : index
    %c0_3 = arith.constant 0 : index
    %c0_4 = arith.constant 0 : index
    %1 = vector.load %arg2[%c0_2, %c0_3, %c0_4] : memref<8x1x32xf32, #tpu.memory_space<vmem>>, vector<8x1x32xf32>
    %2 = vector.broadcast %1 : vector<8x1x32xf32> to vector<8x2x32xf32>
    %3 = arith.addf %0, %2 : vector<8x2x32xf32>
    %c0_5 = arith.constant 0 : index
    %c0_6 = arith.constant 0 : index
    %c0_7 = arith.constant 0 : index
    %4 = vector.load %arg3[%c0_5, %c0_6, %c0_7] : memref<8x2x32xf32, #tpu.memory_space<vmem>>, vector<8x2x32xf32>
    tpu.vector_store %arg3[%c0_5, %c0_6, %c0_7], %3 {strides = array<i32>} : memref<8x2x32xf32, #tpu.memory_space<vmem>>, vector<8x2x32xf32>,
    return
  }
  func.func @transform_0(%arg0: i32) -> (i32, i32, i32) {
    %c0_i32 = arith.constant 0 : i32
    %c0_i32_0 = arith.constant 0 : i32
    %c0_i32_1 = arith.constant 0 : i32
    return %arg0, %c0_i32, %c0_i32_0 : i32, i32, i32
  }
  func.func @transform_1(%arg0: i32) -> (i32, i32, i32) {
    %c0_i32 = arith.constant 0 : i32
    %c0_i32_0 = arith.constant 0 : i32
    %c0_i32_1 = arith.constant 0 : i32
    return %arg0, %c0_i32, %c0_i32_0 : i32, i32, i32
  }
  func.func @transform_2(%arg0: i32) -> (i32, i32, i32) {
    %c0_i32 = arith.constant 0 : i32
    %c0_i32_0 = arith.constant 0 : i32
    %c0_i32_1 = arith.constant 0 : i32
    return %arg0, %c0_i32, %c0_i32_0 : i32, i32, i32
  }
}

</mosaic_0001>

<bundles_post_ra>
// kernel: tpu_custom_call.1
= control target key start
LH: loop header
LB: loop body
LE: loop exit
PB: predicated region body
PF: predicated region fallthrough
CT: control target
= control target key end

     0   :  { %vm60_vm0 = vcmask 254976   ;;  %s201_s0 = inlined_call_operand.vmem [shape: f32[8,2,32], index: 0, kind: input, shape index: {}]   ;;  %s202_s1 = inlined_call_operand.vmem [shape: f32[5000,1,32], index: 1, kind: input, shape index: {}]   ;;  %s203_s2 = inlined_call_operand.hbm [shape: f32[8,2,32], index: 2, kind: output, shape index: {}]  }
   0x1   :  { %v12_v0 = vld [vmem:[%s201_s0] sm:$0x3]  ;;  %v13_v2 = vld [vmem:[%s201_s0 + $0x2] sm:$0x3]  ;;  %v14_v5 = vld [vmem:[%s201_s0 + $0x4] sm:$0x3] }
   0x2   :  { %v90_v1 = vld [vmem:[%s202_s1] ss:$0 sm:$0xff]  ;;  %v91_v4 = vld [vmem:[%s202_s1 + $0x1] ss:$0 sm:$0xff]  ;;  %v92_v6 = vld [vmem:[%s202_s1 + $0x2] ss:$0 sm:$0xff] }
   0x3   :  { %v52_v3 = vadd.f32 %v90_v1, %v12_v0  ;;  %v15_v7 = vld [vmem:[%s201_s0 + $0x6] sm:$0x3]  ;;  %v53_v8 = vadd.f32 %v91_v4, %v13_v2  ;;  %v93_v9 = vld [vmem:[%s202_s1 + $0x3] ss:$0 sm:$0xff]  ;;  %v16_v10 = vld [vmem:[%s201_s0 + $0x8] sm:$0x3]  ;;  %v54_v11 = vadd.f32 %v92_v6, %v14_v5 }
   0x4   :  { %v94_v12 = vld [vmem:[%s202_s1 + $0x4] ss:$0 sm:$0xff]  ;;  %v17_v13 = vld [vmem:[%s201_s0 + $0xa] sm:$0x3]  ;;  %v55_v14 = vadd.f32 %v93_v9, %v15_v7  ;;  %v95_v15 = vld [vmem:[%s202_s1 + $0x5] ss:$0 sm:$0xff] }
   0x5   :  { %61 = vst.msk [vmem:[#allocation2] sm:$0x3] %vm60_vm0, %v52_v3  ;;  %v56_v16 = vadd.f32 %v94_v12, %v16_v10  ;;  %v18_v17 = vld [vmem:[%s201_s0 + $0xc] sm:$0x3]  ;;  %v57_v18 = vadd.f32 %v95_v15, %v17_v13  ;;  %v96_v19 = vld [vmem:[%s202_s1 + $0x6] ss:$0 sm:$0xff] }
   0x6   :  { %62 = vst.msk [vmem:[#allocation2 + $0x2] sm:$0x3] %vm60_vm0, %v53_v8  ;;  %v19_v20 = vld [vmem:[%s201_s0 + $0xe] sm:$0x3]  ;;  %v97_v21 = vld [vmem:[%s202_s1 + $0x7] ss:$0 sm:$0xff]  ;;  %v58_v22 = vadd.f32 %v96_v19, %v18_v17 }
   0x7   :  { %63 = vst.msk [vmem:[#allocation2 + $0x4] sm:$0x3] %vm60_vm0, %v54_v11 }
   0x8   :  { %64 = vst.msk [vmem:[#allocation2 + $0x6] sm:$0x3] %vm60_vm0, %v55_v14 }
   0x9   :  { %65 = vst.msk [vmem:[#allocation2 + $0x8] sm:$0x3] %vm60_vm0, %v56_v16 }
   0xa   :  { %66 = vst.msk [vmem:[#allocation2 + $0xa] sm:$0x3] %vm60_vm0, %v57_v18 }
   0xb   :  { %7 = vsyncpa [#allocation3], 0  ;;  %s124_s13 = smov [#allocation2]   ;;  %s75_s17 = sshll.u32 %s203_s2, 4  ;;  %v59_v23 = vadd.f32 %v97_v21, %v19_v20  ;;  %67 = vst.msk [vmem:[#allocation2 + $0xc] sm:$0x3] %vm60_vm0, %v58_v22  ;;  %s76_s17 = int_to_ptr.hbm [resolvable:$true] %s75_s17 }
   0xc   :  { %s73_s14 = sshll.u32 %s124_s13, 4  ;;  %s125_s0 = smov 32   ;;  %s74_s14 = int_to_ptr.vmem [resolvable:$true] %s73_s14 }
   0xd   :  { %68 = vst.msk [vmem:[#allocation2 + $0xe] sm:$0x3] %vm60_vm0, %v59_v23  ;;  %s126_s18 = smov 2  }
   0xe   :  { %81 = dma.vmem_to_hbm [thread:$0]  %s74_s14, 256, %s76_s17, [#allocation3], %s125_s0, %s125_s0, %s126_s18  }
   0xf   :  { %122 = dma.done.wait [#allocation3], 256  }
  0x10   :  { %123 = vsyncadd [#allocation3], 4294967040 }
  0x11   :  { %86 = vsyncpa [#allocation3], 1 }

</bundles_post_ra>
